<compile_context>
chip_gen: v6e
topology: v6e:2x2x1
jax: 0.10.0
libtpu: 0.0.40
codegen_flags: <defaults>
</compile_context>

<pallas_src>
import jax
import jax.numpy as jnp
from jax.experimental import pallas as pl
from jax.experimental.pallas import tpu as pltpu


def adder_kernel(x_ref, h_ref, wih_ref, whh_ref, b_ref, wfc_ref, bfc_ref, out_ref):
    # x_ref:   (B, T, F)   graph state, batch-first (module layout)
    # h_ref:   (1, B, H)   initial hidden state from the graph RNN
    # wih_ref: (F, H)  whh_ref: (H, H)  b_ref: (1, H) = b_ih + b_hh
    # wfc_ref: (1, H)  fc weight row    bfc_ref: (1,) SMEM scalar
    # out_ref: (B, T)  sigmoid probabilities, final layout
    B, T, F = x_ref.shape
    H = whh_ref.shape[0]

    # Batched input projection for ALL timesteps in one MXU push; bias folded in.
    # (B, T, F) -> (B*T, F): merges leading dims only (minor dim untouched).
    x2 = x_ref[...].reshape(B * T, F)
    xw = jnp.dot(x2, wih_ref[...], preferred_element_type=jnp.float32) + b_ref[...]
    xw = xw.reshape(B, T, H)                                  # (B, T, H)

    whh = whh_ref[...]                                        # (H, H), read once
    wfc = wfc_ref[...]                                        # (1, H), read once
    h = h_ref[0]                                              # (B, H)

    # T is small & static -> unrolled; only h @ W_hh + tanh stays on the serial
    # chain (the xw slices are independent of h, so the scheduler hoists them).
    logits = []
    for t in range(T):
        h = jnp.tanh(xw[:, t, :] +
                     jnp.dot(h, whh, preferred_element_type=jnp.float32))
        # FC head as VPU multiply + lane reduction (keeps the MXU off N=1).
        logits.append(jnp.sum(h * wfc, axis=-1, keepdims=True))   # (B, 1)

    # One concat, one sigmoid, one full lane-dense store in final layout.
    out_ref[...] = jax.nn.sigmoid(jnp.concatenate(logits, axis=1) + bfc_ref[0])

    # TODO(synk): if batch ever grows beyond toy size, add a grid over batch
    # tiles with dimension_semantics=("parallel",) so v7x's second TensorCore
    # is used; at B=2 the per-step grid overhead would dominate.


def adder_forward(x, h, params):
    """x: (B, T, F) f32; h: (1, B, H) f32; returns (B, T, 1) f32."""
    B, T, _ = x.shape
    vmem = pltpu.MemorySpace.VMEM
    smem = pltpu.MemorySpace.SMEM

    out = pl.pallas_call(
        adder_kernel,
        out_shape=jax.ShapeDtypeStruct((B, T), jnp.float32),
        in_specs=[
            pl.BlockSpec(memory_space=vmem),   # x      (B, T, F)
            pl.BlockSpec(memory_space=vmem),   # h      (1, B, H)
            pl.BlockSpec(memory_space=vmem),   # W_ih   (F, H)
            pl.BlockSpec(memory_space=vmem),   # W_hh   (H, H)
            pl.BlockSpec(memory_space=vmem),   # bias   (1, H)
            pl.BlockSpec(memory_space=vmem),   # W_fc   (1, H)
            pl.BlockSpec(memory_space=smem),   # b_fc   (1,) scalar
        ],
        out_specs=pl.BlockSpec(memory_space=vmem),
    )(x, h, params["w_ih"], params["w_hh"], params["bias"],
      params["w_fc"], params["b_fc"])

    # Metadata-only reshape to the module's (B, T, 1) output shape.
    return out[:, :, None]


def init_params(key, node_feature_dim, hidden_dim):
    """Deterministic synthetic parameters (kernel layout, see header note)."""
    k1, k2, k3, k4, k5, k6 = jax.random.split(key, 6)
    s = 0.1
    w_ih = s * jax.random.normal(k1, (node_feature_dim, hidden_dim), jnp.float32)
    w_hh = s * jax.random.normal(k2, (hidden_dim, hidden_dim), jnp.float32)
    b_ih = s * jax.random.normal(k3, (hidden_dim,), jnp.float32)
    b_hh = s * jax.random.normal(k4, (hidden_dim,), jnp.float32)
    w_fc = s * jax.random.normal(k5, (1, hidden_dim), jnp.float32)
    b_fc = s * jax.random.normal(k6, (1,), jnp.float32)
    return {
        "w_ih": w_ih,                                  # (F, H)  = torch W_ih^T
        "w_hh": w_hh,                                  # (H, H)  = torch W_hh^T
        "bias": (b_ih + b_hh).reshape(1, hidden_dim),  # (1, H)
        "w_fc": w_fc,                                  # (1, H)  = torch fc.weight
        "b_fc": b_fc,                                  # (1,)
    }


def adder_reference(x, h, params):
    """Pure-JAX reference of the same forward pass (for correctness check)."""
    B, T, F = x.shape
    ht = h[0]
    outs = []
    for t in range(T):
        ht = jnp.tanh(x[:, t, :] @ params["w_ih"] + ht @ params["w_hh"]
                      + params["bias"])
        logit = jnp.sum(ht * params["w_fc"], axis=-1, keepdims=True) + params["b_fc"][0]
        outs.append(jax.nn.sigmoid(logit))
    return jnp.stack(outs, axis=1)  # (B, T, 1)


if __name__ == "__main__":
    batch = 2
    window_size = 8      # sequence length
    node_feature_dim = 4
    hidden_dim = 32

    key = jax.random.PRNGKey(0)
    kx, kh, kp = jax.random.split(key, 3)
    x = jax.random.normal(kx, (batch, window_size, node_feature_dim), jnp.float32)
    h = jax.random.normal(kh, (1, batch, hidden_dim), jnp.float32)
    params = init_params(kp, node_feature_dim, hidden_dim)

    y = adder_forward(x, h, params)
    y = jax.block_until_ready(y)

    y_ref = adder_reference(x, h, params)
    assert y.shape == (batch, window_size, 1)
    assert jnp.allclose(y, y_ref, atol=1e-5, rtol=1e-5), "mismatch vs JAX reference"

    print("KERNEL_OK")
</pallas_src>

<mosaic_0001>
module attributes {stable_mosaic.version = 11 : i64} {
  func.func @adder_kernel(%arg0: memref<2x8x4xf32, #tpu.memory_space<vmem>>, %arg1: memref<1x2x32xf32, #tpu.memory_space<vmem>>, %arg2: memref<4x32xf32, #tpu.memory_space<vmem>>, %arg3: memref<32x32xf32, #tpu.memory_space<vmem>>, %arg4: memref<1x32xf32, #tpu.memory_space<vmem>>, %arg5: memref<1x32xf32, #tpu.memory_space<vmem>>, %arg6: memref<1xf32, #tpu.memory_space<smem>>, %arg7: memref<2x8xf32, #tpu.memory_space<vmem>>) attributes {dimension_semantics = [], scalar_prefetch = 0 : i64, scratch_operands = 0 : i64, tpu.core_type = #tpu.core_type<tc>} {
    %c0 = arith.constant 0 : index
    %c0_0 = arith.constant 0 : index
    %c0_1 = arith.constant 0 : index
    %0 = vector.load %arg0[%c0, %c0_0, %c0_1] : memref<2x8x4xf32, #tpu.memory_space<vmem>>, vector<2x8x4xf32>
    %1 = vector.shape_cast %0 : vector<2x8x4xf32> to vector<16x4xf32>
    %c0_2 = arith.constant 0 : index
    %c0_3 = arith.constant 0 : index
    %2 = vector.load %arg2[%c0_2, %c0_3] : memref<4x32xf32, #tpu.memory_space<vmem>>, vector<4x32xf32>
    %cst = arith.constant dense<0.000000e+00> : vector<16x32xf32>
    %3 = tpu.matmul %1, %2, %cst {dimension_numbers = #tpu.dot_dimension_numbers<[1], [0], [0], [1], [0, 0, 1, 1], [], []>} : vector<16x4xf32>, vector<4x32xf32>, vector<16x32xf32> -> vector<16x32xf32>
    %c0_4 = arith.constant 0 : index
    %c0_5 = arith.constant 0 : index
    %4 = vector.load %arg4[%c0_4, %c0_5] : memref<1x32xf32, #tpu.memory_space<vmem>>, vector<1x32xf32>
    %5 = vector.broadcast %4 : vector<1x32xf32> to vector<16x32xf32>
    %6 = arith.addf %3, %5 : vector<16x32xf32>
    %7 = vector.shape_cast %6 : vector<16x32xf32> to vector<2x8x32xf32>
    %c0_6 = arith.constant 0 : index
    %c0_7 = arith.constant 0 : index
    %8 = vector.load %arg3[%c0_6, %c0_7] : memref<32x32xf32, #tpu.memory_space<vmem>>, vector<32x32xf32>
    %c0_8 = arith.constant 0 : index
    %c0_9 = arith.constant 0 : index
    %9 = vector.load %arg5[%c0_8, %c0_9] : memref<1x32xf32, #tpu.memory_space<vmem>>, vector<1x32xf32>
    %c0_10 = arith.constant 0 : index
    %c0_11 = arith.constant 0 : index
    %c0_12 = arith.constant 0 : index
    %10 = vector.load %arg1[%c0_10, %c0_11, %c0_12] : memref<1x2x32xf32, #tpu.memory_space<vmem>>, vector<1x2x32xf32>
    %11 = vector.shape_cast %10 : vector<1x2x32xf32> to vector<2x32xf32>
    %12 = vector.extract_strided_slice %7 {offsets = [0, 0, 0], sizes = [2, 1, 32], strides = [1, 1, 1]} : vector<2x8x32xf32> to vector<2x1x32xf32>
    %13 = vector.shape_cast %12 : vector<2x1x32xf32> to vector<2x32xf32>
    %cst_13 = arith.constant dense<0.000000e+00> : vector<2x32xf32>
    %14 = tpu.matmul %11, %8, %cst_13 {dimension_numbers = #tpu.dot_dimension_numbers<[1], [0], [0], [1], [0, 0, 1, 1], [], []>} : vector<2x32xf32>, vector<32x32xf32>, vector<2x32xf32> -> vector<2x32xf32>
    %15 = arith.addf %13, %14 : vector<2x32xf32>
    %16 = math.tanh %15 : vector<2x32xf32>
    %17 = vector.broadcast %9 : vector<1x32xf32> to vector<2x32xf32>
    %18 = arith.mulf %16, %17 : vector<2x32xf32>
    %cst_14 = arith.constant dense<0.000000e+00> : vector<2xf32>
    %19 = vector.multi_reduction <add>, %18, %cst_14 [1] : vector<2x32xf32> to vector<2xf32>
    %20 = vector.shape_cast %19 : vector<2xf32> to vector<2x1xf32>
    %21 = vector.extract_strided_slice %7 {offsets = [0, 1, 0], sizes = [2, 1, 32], strides = [1, 1, 1]} : vector<2x8x32xf32> to vector<2x1x32xf32>
    %22 = vector.shape_cast %21 : vector<2x1x32xf32> to vector<2x32xf32>
    %cst_15 = arith.constant dense<0.000000e+00> : vector<2x32xf32>
    %23 = tpu.matmul %16, %8, %cst_15 {dimension_numbers = #tpu.dot_dimension_numbers<[1], [0], [0], [1], [0, 0, 1, 1], [], []>} : vector<2x32xf32>, vector<32x32xf32>, vector<2x32xf32> -> vector<2x32xf32>
    %24 = arith.addf %22, %23 : vector<2x32xf32>
    %25 = math.tanh %24 : vector<2x32xf32>
    %26 = vector.broadcast %9 : vector<1x32xf32> to vector<2x32xf32>
    %27 = arith.mulf %25, %26 : vector<2x32xf32>
    %cst_16 = arith.constant dense<0.000000e+00> : vector<2xf32>
    %28 = vector.multi_reduction <add>, %27, %cst_16 [1] : vector<2x32xf32> to vector<2xf32>
    %29 = vector.shape_cast %28 : vector<2xf32> to vector<2x1xf32>
    %30 = vector.extract_strided_slice %7 {offsets = [0, 2, 0], sizes = [2, 1, 32], strides = [1, 1, 1]} : vector<2x8x32xf32> to vector<2x1x32xf32>
    %31 = vector.shape_cast %30 : vector<2x1x32xf32> to vector<2x32xf32>
    %cst_17 = arith.constant dense<0.000000e+00> : vector<2x32xf32>
    %32 = tpu.matmul %25, %8, %cst_17 {dimension_numbers = #tpu.dot_dimension_numbers<[1], [0], [0], [1], [0, 0, 1, 1], [], []>} : vector<2x32xf32>, vector<32x32xf32>, vector<2x32xf32> -> vector<2x32xf32>
    %33 = arith.addf %31, %32 : vector<2x32xf32>
    %34 = math.tanh %33 : vector<2x32xf32>
    %35 = vector.broadcast %9 : vector<1x32xf32> to vector<2x32xf32>
    %36 = arith.mulf %34, %35 : vector<2x32xf32>
    %cst_18 = arith.constant dense<0.000000e+00> : vector<2xf32>
    %37 = vector.multi_reduction <add>, %36, %cst_18 [1] : vector<2x32xf32> to vector<2xf32>
    %38 = vector.shape_cast %37 : vector<2xf32> to vector<2x1xf32>
    %39 = vector.extract_strided_slice %7 {offsets = [0, 3, 0], sizes = [2, 1, 32], strides = [1, 1, 1]} : vector<2x8x32xf32> to vector<2x1x32xf32>
    %40 = vector.shape_cast %39 : vector<2x1x32xf32> to vector<2x32xf32>
    %cst_19 = arith.constant dense<0.000000e+00> : vector<2x32xf32>
    %41 = tpu.matmul %34, %8, %cst_19 {dimension_numbers = #tpu.dot_dimension_numbers<[1], [0], [0], [1], [0, 0, 1, 1], [], []>} : vector<2x32xf32>, vector<32x32xf32>, vector<2x32xf32> -> vector<2x32xf32>
    %42 = arith.addf %40, %41 : vector<2x32xf32>
    %43 = math.tanh %42 : vector<2x32xf32>
    %44 = vector.broadcast %9 : vector<1x32xf32> to vector<2x32xf32>
    %45 = arith.mulf %43, %44 : vector<2x32xf32>
    %cst_20 = arith.constant dense<0.000000e+00> : vector<2xf32>
    %46 = vector.multi_reduction <add>, %45, %cst_20 [1] : vector<2x32xf32> to vector<2xf32>
    %47 = vector.shape_cast %46 : vector<2xf32> to vector<2x1xf32>
    %48 = vector.extract_strided_slice %7 {offsets = [0, 4, 0], sizes = [2, 1, 32], strides = [1, 1, 1]} : vector<2x8x32xf32> to vector<2x1x32xf32>
    %49 = vector.shape_cast %48 : vector<2x1x32xf32> to vector<2x32xf32>
    %cst_21 = arith.constant dense<0.000000e+00> : vector<2x32xf32>
    %50 = tpu.matmul %43, %8, %cst_21 {dimension_numbers = #tpu.dot_dimension_numbers<[1], [0], [0], [1], [0, 0, 1, 1], [], []>} : vector<2x32xf32>, vector<32x32xf32>, vector<2x32xf32> -> vector<2x32xf32>
    %51 = arith.addf %49, %50 : vector<2x32xf32>
    %52 = math.tanh %51 : vector<2x32xf32>
    %53 = vector.broadcast %9 : vector<1x32xf32> to vector<2x32xf32>
    %54 = arith.mulf %52, %53 : vector<2x32xf32>
    %cst_22 = arith.constant dense<0.000000e+00> : vector<2xf32>
    %55 = vector.multi_reduction <add>, %54, %cst_22 [1] : vector<2x32xf32> to vector<2xf32>
    %56 = vector.shape_cast %55 : vector<2xf32> to vector<2x1xf32>
    %57 = vector.extract_strided_slice %7 {offsets = [0, 5, 0], sizes = [2, 1, 32], strides = [1, 1, 1]} : vector<2x8x32xf32> to vector<2x1x32xf32>
    %58 = vector.shape_cast %57 : vector<2x1x32xf32> to vector<2x32xf32>
    %cst_23 = arith.constant dense<0.000000e+00> : vector<2x32xf32>
    %59 = tpu.matmul %52, %8, %cst_23 {dimension_numbers = #tpu.dot_dimension_numbers<[1], [0], [0], [1], [0, 0, 1, 1], [], []>} : vector<2x32xf32>, vector<32x32xf32>, vector<2x32xf32> -> vector<2x32xf32>
    %60 = arith.addf %58, %59 : vector<2x32xf32>
    %61 = math.tanh %60 : vector<2x32xf32>
    %62 = vector.broadcast %9 : vector<1x32xf32> to vector<2x32xf32>
    %63 = arith.mulf %61, %62 : vector<2x32xf32>
    %cst_24 = arith.constant dense<0.000000e+00> : vector<2xf32>
    %64 = vector.multi_reduction <add>, %63, %cst_24 [1] : vector<2x32xf32> to vector<2xf32>
    %65 = vector.shape_cast %64 : vector<2xf32> to vector<2x1xf32>
    %66 = vector.extract_strided_slice %7 {offsets = [0, 6, 0], sizes = [2, 1, 32], strides = [1, 1, 1]} : vector<2x8x32xf32> to vector<2x1x32xf32>
    %67 = vector.shape_cast %66 : vector<2x1x32xf32> to vector<2x32xf32>
    %cst_25 = arith.constant dense<0.000000e+00> : vector<2x32xf32>
    %68 = tpu.matmul %61, %8, %cst_25 {dimension_numbers = #tpu.dot_dimension_numbers<[1], [0], [0], [1], [0, 0, 1, 1], [], []>} : vector<2x32xf32>, vector<32x32xf32>, vector<2x32xf32> -> vector<2x32xf32>
    %69 = arith.addf %67, %68 : vector<2x32xf32>
    %70 = math.tanh %69 : vector<2x32xf32>
    %71 = vector.broadcast %9 : vector<1x32xf32> to vector<2x32xf32>
    %72 = arith.mulf %70, %71 : vector<2x32xf32>
    %cst_26 = arith.constant dense<0.000000e+00> : vector<2xf32>
    %73 = vector.multi_reduction <add>, %72, %cst_26 [1] : vector<2x32xf32> to vector<2xf32>
    %74 = vector.shape_cast %73 : vector<2xf32> to vector<2x1xf32>
    %75 = vector.extract_strided_slice %7 {offsets = [0, 7, 0], sizes = [2, 1, 32], strides = [1, 1, 1]} : vector<2x8x32xf32> to vector<2x1x32xf32>
    %76 = vector.shape_cast %75 : vector<2x1x32xf32> to vector<2x32xf32>
    %cst_27 = arith.constant dense<0.000000e+00> : vector<2x32xf32>
    %77 = tpu.matmul %70, %8, %cst_27 {dimension_numbers = #tpu.dot_dimension_numbers<[1], [0], [0], [1], [0, 0, 1, 1], [], []>} : vector<2x32xf32>, vector<32x32xf32>, vector<2x32xf32> -> vector<2x32xf32>
    %78 = arith.addf %76, %77 : vector<2x32xf32>
    %79 = math.tanh %78 : vector<2x32xf32>
    %80 = vector.broadcast %9 : vector<1x32xf32> to vector<2x32xf32>
    %81 = arith.mulf %79, %80 : vector<2x32xf32>
    %cst_28 = arith.constant dense<0.000000e+00> : vector<2xf32>
    %82 = vector.multi_reduction <add>, %81, %cst_28 [1] : vector<2x32xf32> to vector<2xf32>
    %83 = vector.shape_cast %82 : vector<2xf32> to vector<2x1xf32>
    %84 = tpu.concatenate %20, %29, %38, %47, %56, %65, %74, %83 in 1 : vector<2x1xf32>, vector<2x1xf32>, vector<2x1xf32>, vector<2x1xf32>, vector<2x1xf32>, vector<2x1xf32>, vector<2x1xf32>, vector<2x1xf32> -> vector<2x8xf32>
    %c0_29 = arith.constant 0 : index
    %85 = memref.load %arg6[%c0_29] : memref<1xf32, #tpu.memory_space<smem>>
    %86 = vector.broadcast %85 : f32 to vector<2x8xf32>
    %87 = arith.addf %84, %86 : vector<2x8xf32>
    %88 = arith.negf %87 : vector<2x8xf32>
    %89 = math.exp %88 : vector<2x8xf32>
    %cst_30 = arith.constant 1.000000e+00 : f32
    %90 = vector.broadcast %cst_30 : f32 to vector<2x8xf32>
    %91 = arith.addf %90, %89 : vector<2x8xf32>
    %92 = arith.divf %90, %91 : vector<2x8xf32>
    %c0_31 = arith.constant 0 : index
    %c0_32 = arith.constant 0 : index
    %93 = vector.load %arg7[%c0_31, %c0_32] : memref<2x8xf32, #tpu.memory_space<vmem>>, vector<2x8xf32>
    tpu.vector_store %arg7[%c0_31, %c0_32], %92 {strides = array<i32>} : memref<2x8xf32, #tpu.memory_space<vmem>>, vector<2x8xf32>,
    return
  }
}

</mosaic_0001>

<bundles_post_ra>
// kernel: tpu_custom_call.1
= control target key start
LH: loop header
LB: loop body
LE: loop exit
PB: predicated region body
PF: predicated region fallthrough
CT: control target
= control target key end

     0   :  { %13 = vsyncpa [#allocation4], 0  ;;  %s1448_s0 = inlined_call_operand.vmem [shape: f32[2,8,4], index: 0, kind: input, shape index: {}]   ;;  %s1449_s1 = inlined_call_operand.vmem [shape: f32[1,2,32], index: 1, kind: input, shape index: {}]   ;;  %s1450_s2 = inlined_call_operand.vmem [shape: f32[4,32], index: 2, kind: input, shape index: {}]   ;;  %s1451_s3 = inlined_call_operand.hbm [shape: f32[32,32], index: 3, kind: input, shape index: {}]   ;;  %s1452_s4 = inlined_call_operand.vmem [shape: f32[1,32], index: 4, kind: input, shape index: {}]   ;;  %s1453_s5 = inlined_call_operand.vmem [shape: f32[1,32], index: 5, kind: input, shape index: {}]   ;;  %s1454_s6 = inlined_call_operand.<no memory space> [shape: f32[1], index: 6, kind: input, shape index: {}]   ;;  %s1455_s7 = inlined_call_operand.hbm [shape: f32[2,8], index: 7, kind: output, shape index: {}]  }
   0x1   :  { %14 = vsyncpa [#allocation5], 0  ;;  %s1230_s24 = smov [#allocation3]  }
   0x2   :  { %s26_s25 = sshll.u32 %s1230_s24, 4  ;;  %s27_s25 = int_to_ptr.vmem [resolvable:$true] %s26_s25 }
   0x3   :  { %s1194_s26 = scalar_lea.vmem %s27_s25, 512  ;;  %p1199_p1 = scmp.lt.s32.totalorder %s27_s25, %s27_s25 }
   0x4   :  { %p1195_p0 = scmp.ne.s32.totalorder %s27_s25, %s1194_s26  ;;  %p1200_p2 = scmp.lt.s32.totalorder %s1194_s26, %s1194_s26 }
   0x6   :  { %p1201_p3 = por %p1200_p2, %p1199_p1 }
   0x8   :  { %p1202_p4 = pnand %p1201_p3, %p1195_p0 }
   0xa   :  { %1205 = shalt.err (!%p1202_p4)
}
   0xb   :  { %s1231_s27 = smov 128   ;;  %s1232_s28 = smov 8  }
   0xc   :  { %32 = dma.hbm_to_vmem [thread:$0]  %s1451_s3, 512, %s27_s25, [#allocation4], %s1231_s27, %s1231_s27, %s1232_s28  }
   0xd   :  { %1226 = dma.done.wait [#allocation4], 512  }
   0xe   :  { %1227 = vsyncadd [#allocation4], 4294966784  ;;  %v1233_v0 = vmov 0.0   ;;  %vm1234_vm0 = vmmov 0   ;;  %vm59_vm1 = vcmask 1043456   ;;  %v1282_v1 = vld [vmem:[#allocation3 + $0x18] sm:$0xff] }
   0xf   :  { %1056 = vmatprep.subr.mxu1 %v1233_v0  ;;  %1064 = vmatprep.mubr.msk.f32.mxu1 %vm1234_vm0, %v1233_v0  ;;  %v44_v2 = vld [vmem:[%s1450_s2] sm:$0xf]  ;;  %vm52_vm2 = vcmask 31744   ;;  %v1291_v4 = vld [vmem:[#allocation3 + $0x10] sm:$0xff]  ;;  %v43_v5 = vld [vmem:[%s1448_s0 + $0x8] sm:$0xff]  ;;  %vm144_vm3 = vcmask 261120  }
  0x10   :  { %v42_v3 = vld [vmem:[%s1448_s0] sm:$0xff]  ;;  %1057 = vmatpush3.msra.mxu1 %v1282_v1  ;;  %1051 = vmatprep.subr.msk.mxu0 %vm59_vm1, %v44_v2  ;;  %v1297_v6 = vld [vmem:[#allocation3 + $0x8] sm:$0xff]  ;;  %vm237_vm4 = vcmask 1041409   ;;  %vm240_vm5 = vcmask 254976   ;;  %vm333_vm6 = vcmask 1042434   ;;  %vm336_vm7 = vcmask 256001  }
  0x11   :  { %1058 = vmatprep.subr.mxu1 %v1233_v0  ;;  %1052 = vmatpush3.msk.msra.mxu0 %vm59_vm1, %v44_v2  ;;  %v1303_v7 = vld [vmem:[#allocation3] sm:$0xff]  ;;  %vm430_vm8 = vcmask 1043459   ;;  %vm433_vm9 = vcmask 257026   ;;  %vm528_vm10 = vcmask 1044484   ;;  %vm531_vm11 = vcmask 258051   ;;  %s1235_s16 = smov [#allocation6]  }
  0x12   :  { %1053 = vmatprep.mubr.msk.f32.mxu0 %vm52_vm2, %v42_v3  ;;  %1059 = vmatpush3.msra.mxu1 %v1291_v4  ;;  %v143_v8 = vld [vmem:[%s1449_s1] sm:$0x3]  ;;  %vm626_vm12 = vcmask 1045509   ;;  %vm629_vm13 = vcmask 259076   ;;  %vm724_vm14 = vcmask 1046534   ;;  %vm727_vm15 = vcmask 260101  }
  0x13   :  { %1054 = vmatmul.mubr.msk.f32.vlgmr.msra.gmra.mxu0 %vm52_vm2, %v43_v5  ;;  %1060 = vmatprep.subr.mxu1 %v1233_v0  ;;  %v994_v10 = vld [vmem:[%s1452_s4] ss:$0 sm:$0xff]  ;;  %vm825_vm1 = vcmask 261126   ;;  %s985_s17 = sshll.u32 %s1235_s16, 4  ;;  %s986_s17 = int_to_ptr.vmem [resolvable:$true] %s985_s17 }
  0x14   :  { %1061 = vmatpush3.msra.mxu1 %v1297_v6  ;;  %1067 = vmatprep.subr.mxu0 %v1233_v0  ;;  %v1346_v21 = vld [vmem:[%s1453_s5] ss:$0 sm:$0xff]  ;;  %s1206_s18 = scalar_lea.vmem %s986_s17, 32  ;;  %p1211_p6 = scmp.lt.s32.totalorder %s986_s17, %s986_s17 }
  0x15   :  { %1062 = vmatprep.subr.mxu1 %v1233_v0  ;;  %1068 = vmatpush3.msra.mxu0 %v1282_v1  ;;  %p1207_p5 = scmp.ne.s32.totalorder %s986_s17, %s1206_s18  ;;  %p1212_p7 = scmp.lt.s32.totalorder %s1206_s18, %s1206_s18 }
  0x16   :  { %1063 = vmatpush3.msra.mxu1 %v1303_v7  ;;  %1069 = vmatprep.subr.mxu0 %v1233_v0 }
  0x17   :  { %1065 = vmatmul.mubr.msk.f32.vlgmr.msra.gmra.mxu1 %vm144_vm3, %v143_v8  ;;  %1070 = vmatpush3.msra.mxu0 %v1291_v4  ;;  %p1213_p8 = por %p1212_p7, %p1211_p6 }
  0x18   :  { %1071 = vmatprep.subr.mxu0 %v1233_v0  ;;  %1075 = vmatprep.mubr.msk.f32.mxu0 %vm1234_vm0, %v1233_v0 }
  0x19   :  { %1072 = vmatpush3.msra.mxu0 %v1297_v6  ;;  %1078 = vmatprep.subr.mxu1 %v1233_v0  ;;  %p1214_p9 = pnand %p1213_p8, %p1207_p5 }
  0x1a   :  { %1073 = vmatprep.subr.mxu0 %v1233_v0  ;;  %1079 = vmatpush3.msra.mxu1 %v1282_v1 }
  0x1b   :  { %1074 = vmatpush3.msra.mxu0 %v1303_v7  ;;  %1080 = vmatprep.subr.mxu1 %v1233_v0 }
  0x1c   :  { %1081 = vmatpush3.msra.mxu1 %v1291_v4  ;;  %1086 = vmatprep.mubr.msk.f32.mxu1 %vm1234_vm0, %v1233_v0 }
  0x1d   :  { %1082 = vmatprep.subr.mxu1 %v1233_v0  ;;  %1089 = vmatprep.subr.mxu0 %v1233_v0 }
  0x1e   :  { %1083 = vmatpush3.msra.mxu1 %v1297_v6 }
  0x1f   :  { %1084 = vmatprep.subr.mxu1 %v1233_v0 }
  0x20   :  { %1085 = vmatpush3.msra.mxu1 %v1303_v7 }
  0x21   :  { %1100 = vmatprep.subr.mxu1 %v1233_v0 }
  0xd3   :  { %v1055_v9 = vpop.f32.mrf.mxu0 }
  0xd4   :  { %v1337_v12 = vadd.f32 %v1055_v9, %v994_v10 }
  0xd5   :  { %v129_v11 = vpop.f32.mrf.mxu0 }
  0xd6   :  { %v1339_v13 = vadd.f32 %v994_v10, %v129_v11 }
  0xd7   :  { %v214_v14 = vpop.f32.mrf.mxu1 }
  0xd8   :  { %v219_v15 = vrot.slane %v214_v14, 1  ;;  %v222_v16 = vadd.f32 %v214_v14, %v1339_v13 }
  0xd9   :  { %v1066_v17 = vpop.f32.mrf.mxu1 }
  0xda   :  { %v223_v18 = vadd.f32 %v219_v15, %v1337_v12  ;;  %1150 = vtanh.f32 %v222_v16 }
  0xdc   :  { %1152 = vtanh.f32 %v223_v18 }
  0xe7   :  { %v1151_v19 = vpop.eup %1150 }
  0xe8   :  { %v232_v25 = vmul.f32 %v1151_v19, %v1346_v21 }
  0xe9   :  { %v1153_v20 = vpop.eup %1152 }
  0xea   :  { %v246_v22 = vrot.slane %v1153_v20, 7  ;;  %v233_v23 = vmul.f32 %v1153_v20, %v1346_v21 }
  0xec   :  { %v247_v24 = vsel %vm237_vm4, %v246_v22, %v1151_v19  ;;  %v236_v26 = vrot.slane %v233_v23, 7 }
  0xed   :  { %1076 = vmatmul.mubr.msk.f32.vlgmr.msra.gmra.mxu0 %vm144_vm3, %v247_v24 }
  0xee   :  { %v238_v27 = vsel %vm237_vm4, %v236_v26, %v232_v25  ;;  %1090 = vmatpush3.msra.mxu0 %v1282_v1  ;;  %1097 = vmatprep.mubr.msk.f32.mxu0 %vm1234_vm0, %v1233_v0 }
  0xef   :  { %v241_v28 = vsel %vm240_vm5, %v238_v27, 0.0  ;;  %1091 = vmatprep.subr.mxu0 %v1233_v0  ;;  %vm955_vm5 = vcmask 7168  }
  0xf0   :  { %242 = vadd.xlane.f32.xlu1 %v241_v28  ;;  %1092 = vmatpush3.msra.mxu0 %v1291_v4 }
  0xf1   :  { %1093 = vmatprep.subr.mxu0 %v1233_v0 }
  0xf2   :  { %1094 = vmatpush3.msra.mxu0 %v1297_v6 }
  0xf3   :  { %1095 = vmatprep.subr.mxu0 %v1233_v0 }
  0xf4   :  { %1096 = vmatpush3.msra.mxu0 %v1303_v7 }
  0xf5   :  { %1111 = vmatprep.subr.mxu0 %v1233_v0 }
 0x1ad   :  { %v316_v29 = vpop.f32.mrf.mxu0 }
 0x1ae   :  { %v321_v30 = vrot.slane %v316_v29, 7  ;;  %v325_v31 = vadd.f32 %v316_v29, %v1337_v12 }
 0x1af   :  { %v1077_v32 = vpop.f32.mrf.mxu0 }
 0x1b0   :  { %v324_v33 = vadd.f32 %v321_v30, %v1339_v13  ;;  %1154 = vtanh.f32 %v325_v31 }
 0x1b2   :  { %1156 = vtanh.f32 %v324_v33 }
 0x1bd   :  { %v1155_v34 = vpop.eup %1154 }
 0x1be   :  { %v329_v35 = vmul.f32 %v1155_v34, %v1346_v21 }
 0x1bf   :  { %v1157_v36 = vpop.eup %1156 }
 0x1c0   :  { %v342_v37 = vrot.slane %v1157_v36, 1  ;;  %v328_v38 = vmul.f32 %v1157_v36, %v1346_v21  ;;  %v332_v39 = vrot.slane %v329_v35, 7 }
 0x1c2   :  { %v343_v40 = vsel %vm237_vm4, %v1155_v34, %v342_v37  ;;  %v334_v41 = vsel %vm333_vm6, %v332_v39, %v328_v38  ;;  %vm957_vm6 = vcmask 15360  }
 0x1c3   :  { %1087 = vmatmul.mubr.msk.f32.vlgmr.msra.gmra.mxu1 %vm144_vm3, %v343_v40  ;;  %v337_v42 = vsel %vm336_vm7, %v334_v41, 0.0  ;;  %vm959_vm7 = vcmask 23552  }
 0x1c4   :  { %338 = vadd.xlane.f32.xlu0 %v337_v42  ;;  %1101 = vmatpush3.msra.mxu1 %v1282_v1 }
 0x1c5   :  { %1102 = vmatprep.subr.mxu1 %v1233_v0  ;;  %1108 = vmatprep.mubr.msk.f32.mxu1 %vm1234_vm0, %v1233_v0 }
 0x1c6   :  { %1103 = vmatpush3.msra.mxu1 %v1291_v4 }
 0x1c7   :  { %1104 = vmatprep.subr.mxu1 %v1233_v0 }
 0x1c8   :  { %1105 = vmatpush3.msra.mxu1 %v1297_v6 }
 0x1c9   :  { %1106 = vmatprep.subr.mxu1 %v1233_v0 }
 0x1ca   :  { %1107 = vmatpush3.msra.mxu1 %v1303_v7 }
 0x1cb   :  { %1122 = vmatprep.subr.mxu1 %v1233_v0 }
 0x283   :  { %v412_v43 = vpop.f32.mrf.mxu1 }
 0x284   :  { %v417_v44 = vrot.slane %v412_v43, 6  ;;  %v418_v45 = vrot.slane %v412_v43, 7 }
 0x285   :  { %v1088_v46 = vpop.f32.mrf.mxu1 }
 0x286   :  { %v421_v47 = vadd.f32 %v417_v44, %v1339_v13  ;;  %v422_v48 = vadd.f32 %v418_v45, %v1337_v12 }
 0x288   :  { %1158 = vtanh.f32 %v421_v47 }
 0x289   :  { %1160 = vtanh.f32 %v422_v48 }
 0x295   :  { %v1159_v49 = vpop.eup %1158 }
 0x296   :  { %v1161_v50 = vpop.eup %1160  ;;  %v439_v51 = vrot.slane %v1159_v49, 2  ;;  %v425_v55 = vmul.f32 %v1159_v49, %v1346_v21 }
 0x297   :  { %v440_v52 = vrot.slane %v1161_v50, 1  ;;  %v426_v53 = vmul.f32 %v1161_v50, %v1346_v21 }
 0x299   :  { %v441_v54 = vsel %vm237_vm4, %v440_v52, %v439_v51  ;;  %v429_v56 = vrot.slane %v426_v53, 7 }
 0x29a   :  { %1098 = vmatmul.mubr.msk.f32.vlgmr.msra.gmra.mxu0 %vm144_vm3, %v441_v54 }
 0x29b   :  { %v431_v57 = vsel %vm430_vm8, %v429_v56, %v425_v55  ;;  %1112 = vmatpush3.msra.mxu0 %v1282_v1  ;;  %1119 = vmatprep.mubr.msk.f32.mxu0 %vm1234_vm0, %v1233_v0  ;;  %vm962_vm8 = vcmask 39936  }
 0x29c   :  { %v434_v58 = vsel %vm433_vm9, %v431_v57, 0.0  ;;  %1113 = vmatprep.subr.mxu0 %v1233_v0  ;;  %vm964_vm9 = vcmask 48128  }
 0x29d   :  { %435 = vadd.xlane.f32.xlu0 %v434_v58  ;;  %1114 = vmatpush3.msra.mxu0 %v1291_v4 }
 0x29e   :  { %1115 = vmatprep.subr.mxu0 %v1233_v0 }
 0x29f   :  { %1116 = vmatpush3.msra.mxu0 %v1297_v6 }
 0x2a0   :  { %1117 = vmatprep.subr.mxu0 %v1233_v0 }
 0x2a1   :  { %1118 = vmatpush3.msra.mxu0 %v1303_v7 }
 0x2a2   :  { %1133 = vmatprep.subr.mxu0 %v1233_v0 }
 0x35a   :  { %v510_v59 = vpop.f32.mrf.mxu0 }
 0x35b   :  { %v515_v60 = vrot.slane %v510_v59, 5  ;;  %v516_v61 = vrot.slane %v510_v59, 6 }
 0x35c   :  { %v1099_v62 = vpop.f32.mrf.mxu0 }
 0x35d   :  { %v519_v63 = vadd.f32 %v515_v60, %v1339_v13  ;;  %v520_v2 = vadd.f32 %v516_v61, %v1337_v12 }
 0x35f   :  { %1162 = vtanh.f32 %v519_v63 }
 0x360   :  { %1164 = vtanh.f32 %v520_v2 }
 0x36c   :  { %v1163_v3 = vpop.eup %1162 }
 0x36d   :  { %v1165_v5 = vpop.eup %1164  ;;  %v537_v8 = vrot.slane %v1163_v3, 3  ;;  %v523_v14 = vmul.f32 %v1163_v3, %v1346_v21 }
 0x36e   :  { %v538_v9 = vrot.slane %v1165_v5, 2  ;;  %v524_v10 = vmul.f32 %v1165_v5, %v1346_v21 }
 0x370   :  { %v539_v11 = vsel %vm237_vm4, %v538_v9, %v537_v8  ;;  %v527_v15 = vrot.slane %v524_v10, 7 }
 0x371   :  { %1109 = vmatmul.mubr.msk.f32.vlgmr.msra.gmra.mxu1 %vm144_vm3, %v539_v11 }
 0x372   :  { %v529_v16 = vsel %vm528_vm10, %v527_v15, %v523_v14  ;;  %1123 = vmatpush3.msra.mxu1 %v1282_v1  ;;  %1130 = vmatprep.mubr.msk.f32.mxu1 %vm1234_vm0, %v1233_v0  ;;  %vm950_vm10 = vcmask 1040384  }
 0x373   :  { %v532_v17 = vsel %vm531_vm11, %v529_v16, 0.0  ;;  %1124 = vmatprep.subr.mxu1 %v1233_v0  ;;  %vm966_vm11 = vcmask 56320  }
 0x374   :  { %533 = vadd.xlane.f32.xlu1 %v532_v17  ;;  %1125 = vmatpush3.msra.mxu1 %v1291_v4 }
 0x375   :  { %1126 = vmatprep.subr.mxu1 %v1233_v0 }
 0x376   :  { %1127 = vmatpush3.msra.mxu1 %v1297_v6 }
 0x377   :  { %1128 = vmatprep.subr.mxu1 %v1233_v0 }
 0x378   :  { %1129 = vmatpush3.msra.mxu1 %v1303_v7 }
 0x431   :  { %v608_v18 = vpop.f32.mrf.mxu1 }
 0x432   :  { %v613_v19 = vrot.slane %v608_v18, 4  ;;  %v614_v20 = vrot.slane %v608_v18, 5  ;;  %v339_v18 = vpop.xlane.xlu0 %338 }
 0x433   :  { %v1110_v22 = vpop.f32.mrf.mxu1 }
 0x434   :  { %v617_v23 = vadd.f32 %v613_v19, %v1339_v13  ;;  %v618_v24 = vadd.f32 %v614_v20, %v1337_v12  ;;  %v243_v19 = vpop.xlane.xlu1 %242  ;;  %v931_v22 = vrot.slane %v339_v18, 1 }
 0x436   :  { %1166 = vtanh.f32 %v617_v23 }
 0x437   :  { %1168 = vtanh.f32 %v618_v24 }
 0x438   :  { %v534_v20 = vpop.xlane.xlu1 %533 }
 0x443   :  { %v1167_v25 = vpop.eup %1166 }
 0x444   :  { %v1169_v26 = vpop.eup %1168  ;;  %v635_v27 = vrot.slane %v1167_v25, 4  ;;  %v621_v31 = vmul.f32 %v1167_v25, %v1346_v21  ;;  %v937_v25 = vrot.slane %v534_v20, 3 }
 0x445   :  { %v636_v28 = vrot.slane %v1169_v26, 3  ;;  %v622_v29 = vmul.f32 %v1169_v26, %v1346_v21 }
 0x447   :  { %v637_v30 = vsel %vm237_vm4, %v636_v28, %v635_v27  ;;  %v625_v32 = vrot.slane %v622_v29, 7  ;;  %v956_v27 = vsel %vm955_vm5, %v243_v19, %v931_v22 }
 0x448   :  { %1120 = vmatmul.mubr.msk.f32.vlgmr.msra.gmra.mxu0 %vm144_vm3, %v637_v30 }
 0x449   :  { %v627_v33 = vsel %vm626_vm12, %v625_v32, %v621_v31  ;;  %1134 = vmatpush3.msra.mxu0 %v1282_v1  ;;  %1141 = vmatprep.mubr.msk.f32.mxu0 %vm1234_vm0, %v1233_v0  ;;  %vm822_vm0 = vcmask 1047559  }
 0x44a   :  { %v630_v34 = vsel %vm629_vm13, %v627_v33, 0.0  ;;  %1135 = vmatprep.subr.mxu0 %v1233_v0 }
 0x44b   :  { %631 = vadd.xlane.f32.xlu0 %v630_v34  ;;  %1136 = vmatpush3.msra.mxu0 %v1291_v4 }
 0x44c   :  { %1137 = vmatprep.subr.mxu0 %v1233_v0 }
 0x44d   :  { %1138 = vmatpush3.msra.mxu0 %v1297_v6 }
 0x44e   :  { %1139 = vmatprep.subr.mxu0 %v1233_v0 }
 0x44f   :  { %1140 = vmatpush3.msra.mxu0 %v1303_v7 }
 0x508   :  { %v706_v35 = vpop.f32.mrf.mxu0 }
 0x509   :  { %v711_v36 = vrot.slane %v706_v35, 3  ;;  %v712_v1 = vrot.slane %v706_v35, 4 }
 0x50a   :  { %v1121_v37 = vpop.f32.mrf.mxu0 }
 0x50b   :  { %v715_v38 = vadd.f32 %v711_v36, %v1339_v13  ;;  %v716_v39 = vadd.f32 %v712_v1, %v1337_v12  ;;  %v969_v37 = vstv %s1454_s6 }
 0x50d   :  { %1170 = vtanh.f32 %v715_v38 }
 0x50e   :  { %1172 = vtanh.f32 %v716_v39 }
 0x51a   :  { %v1171_v40 = vpop.eup %1170 }
 0x51b   :  { %v1173_v4 = vpop.eup %1172  ;;  %v733_v41 = vrot.slane %v1171_v40, 5  ;;  %v719_v7 = vmul.f32 %v1171_v40, %v1346_v21 }
 0x51c   :  { %v734_v42 = vrot.slane %v1173_v4, 4  ;;  %v720_v6 = vmul.f32 %v1173_v4, %v1346_v21 }
 0x51e   :  { %v735_v0 = vsel %vm237_vm4, %v734_v42, %v733_v41  ;;  %v723_v43 = vrot.slane %v720_v6, 7 }
 0x51f   :  { %1131 = vmatmul.mubr.msk.f32.vlgmr.msra.gmra.mxu1 %vm144_vm3, %v735_v0 }
 0x520   :  { %v725_v44 = vsel %vm724_vm14, %v723_v43, %v719_v7 }
 0x521   :  { %v728_v45 = vsel %vm727_vm15, %v725_v44, 0.0 }
 0x522   :  { %729 = vadd.xlane.f32.xlu1 %v728_v45 }
 0x5ab   :  { %v730_v23 = vpop.xlane.xlu1 %729 }
 0x5ac   :  { %v943_v28 = vrot.slane %v730_v23, 5 }
 0x5df   :  { %v804_v46 = vpop.f32.mrf.mxu1 }
 0x5e0   :  { %v809_v47 = vrot.slane %v804_v46, 2  ;;  %v810_v48 = vrot.slane %v804_v46, 3 }
 0x5e1   :  { %v1132_v49 = vpop.f32.mrf.mxu1 }
 0x5e2   :  { %v813_v50 = vadd.f32 %v809_v47, %v1339_v13  ;;  %v814_v51 = vadd.f32 %v810_v48, %v1337_v12 }
 0x5e4   :  { %1174 = vtanh.f32 %v813_v50 }
 0x5e5   :  { %1176 = vtanh.f32 %v814_v51 }
 0x5f1   :  { %v1175_v52 = vpop.eup %1174 }
 0x5f2   :  { %v1177_v53 = vpop.eup %1176  ;;  %v831_v54 = vrot.slane %v1175_v52, 6  ;;  %v817_v58 = vmul.f32 %v1175_v52, %v1346_v21 }
 0x5f3   :  { %v832_v55 = vrot.slane %v1177_v53, 5  ;;  %v818_v56 = vmul.f32 %v1177_v53, %v1346_v21 }
 0x5f5   :  { %v833_v57 = vsel %vm237_vm4, %v832_v55, %v831_v54  ;;  %v821_v59 = vrot.slane %v818_v56, 7  ;;  %vm922_vm4 = vcmask 261127  }
 0x5f6   :  { %1142 = vmatmul.mubr.msk.f32.vlgmr.msra.gmra.mxu0 %vm144_vm3, %v833_v57  ;;  %vm926_vm3 = vcmask 253952  }
 0x5f7   :  { %v823_v60 = vsel %vm822_vm0, %v821_v59, %v817_v58 }
 0x5f8   :  { %v826_v61 = vsel %vm825_vm1, %v823_v60, 0.0 }
 0x5f9   :  { %827 = vadd.xlane.f32.xlu0 %v826_v61 }
 0x6b6   :  { %v902_v62 = vpop.f32.mrf.mxu0 }
 0x6b7   :  { %v907_v63 = vrot.slane %v902_v62, 1  ;;  %v908_v2 = vrot.slane %v902_v62, 2 }
 0x6b8   :  { %v1143_v3 = vpop.f32.mrf.mxu0 }
 0x6b9   :  { %v911_v5 = vadd.f32 %v907_v63, %v1339_v13  ;;  %v912_v8 = vadd.f32 %v908_v2, %v1337_v12  ;;  %v436_v13 = vpop.xlane.xlu0 %435 }
 0x6ba   :  { %v934_v24 = vrot.slane %v436_v13, 2 }
 0x6bb   :  { %1178 = vtanh.f32 %v911_v5 }
 0x6bc   :  { %1180 = vtanh.f32 %v912_v8  ;;  %v958_v30 = vsel %vm957_vm6, %v956_v27, %v934_v24 }
 0x6bd   :  { %v632_v12 = vpop.xlane.xlu0 %631  ;;  %v960_v32 = vsel %vm959_vm7, %v958_v30, %v937_v25 }
 0x6c1   :  { %v828_v26 = vpop.xlane.xlu0 %827 }
 0x6c2   :  { %v946_v31 = vrot.slane %v828_v26, 6 }
 0x6c8   :  { %v1179_v9 = vpop.eup %1178 }
 0x6c9   :  { %v1181_v10 = vpop.eup %1180  ;;  %v915_v11 = vmul.f32 %v1179_v9, %v1346_v21 }
 0x6ca   :  { %v916_v14 = vmul.f32 %v1181_v10, %v1346_v21  ;;  %v940_v21 = vrot.slane %v632_v12, 4 }
 0x6cb   :  { %v923_v15 = vsel %vm922_vm4, %v915_v11, 0.0 }
 0x6cc   :  { %924 = vadd.xlane.f32.xlu1 %v923_v15  ;;  %v919_v16 = vrot.slane %v916_v14, 7  ;;  %v961_v34 = vsel %vm52_vm2, %v960_v32, %v940_v21  ;;  %vm977_vm2 = vcmask 58368  }
 0x6cd   :  { %v963_v1 = vsel %vm962_vm8, %v961_v34, %v943_v28 }
 0x6ce   :  { %v927_v17 = vsel %vm926_vm3, %v919_v16, 0.0  ;;  %v965_v38 = vsel %vm964_vm9, %v963_v1, %v946_v31 }
 0x6cf   :  { %928 = vadd.xlane.f32.xlu0 %v927_v17 }
 0x755   :  { %v925_v29 = vpop.xlane.xlu1 %924 }
 0x756   :  { %v951_v35 = vrot.slane %v925_v29, 7 }
 0x758   :  { %v929_v33 = vpop.xlane.xlu0 %928 }
 0x759   :  { %v952_v36 = vrot.slane %v929_v33, 7 }
 0x75b   :  { %v953_v39 = vsel %vm950_vm10, %v951_v35, %v952_v36 }
 0x75c   :  { %v967_v40 = vsel %vm966_vm11, %v965_v38, %v953_v39 }
 0x75d   :  { %v970_v4 = vadd.f32 %v969_v37, %v967_v40 }
 0x75f   :  { %v1007_v41 = vmul.f32 -1.442695, %v970_v4 }
 0x761   :  { %1182 = vpow2.f32 %v1007_v41 }
 0x76e   :  { %v1183_v42 = vpop.eup %1182 }
 0x76f   :  { %v974_v6 = vadd.f32 1.0, %v1183_v42 }
 0x771   :  { %1184 = vrcp.f32 %v974_v6 }
 0x77e   :  { %v1185_v0 = vpop.eup %1184 }
 0x77f   :  { %978 = vst.msk [vmem:[#allocation6] sm:$0x3] %vm977_vm2, %v1185_v0 }
 0x780   :  { %1217 = shalt.err (!%p1214_p9)
}
 0x781   :  { %988 = dma.vmem_to_hbm [thread:$0]  %s986_s17, 32, %s1455_s7, [#allocation5]  }
 0x782   :  { %1228 = dma.done.wait [#allocation5], 32  }
 0x783   :  { %1229 = vsyncadd [#allocation5], 4294967264 }
 0x784   :  { %992 = vsyncpa [#allocation4], 1 }
 0x785   :  { %993 = vsyncpa [#allocation5], 1 }

</bundles_post_ra>
